<compile_context>
chip_gen: v6e
topology: v6e:2x2x1
jax: 0.10.0
libtpu: 0.0.40
codegen_flags: <defaults>
</compile_context>

<pallas_src>
import functools

import jax
import jax.numpy as jnp
from jax.experimental import pallas as pl
from jax.experimental.pallas import tpu as pltpu

# SELU constants (match torch.nn.SELU)
_SELU_ALPHA = 1.6732632423543772848170429916717
_SELU_SCALE = 1.0507009873554804934193349852946
_LN_EPS = 1e-5
_LANE = 128


def _round_up(n, m):
    return ((n + m - 1) // m) * m


def _selu(x):
    return _SELU_SCALE * jnp.where(x > 0, x, _SELU_ALPHA * (jnp.exp(x) - 1.0))


def _layernorm_padzero(h, gamma, beta, true_dim):
    """LayerNorm over the first `true_dim` lanes of h.

    Assumes pad lanes of h are exactly zero (zero-padded weight columns and
    biases), so plain full-width sums equal the true-lane sums. gamma/beta are
    zero on pad lanes, so pad lanes come out as exact zeros again.
    """
    inv_n = jnp.float32(1.0 / true_dim)
    s1 = jnp.sum(h, axis=-1, keepdims=True)
    s2 = jnp.sum(h * h, axis=-1, keepdims=True)
    mu = s1 * inv_n
    var = jnp.maximum(s2 * inv_n - mu * mu, 0.0)     # guard tiny negative rounding
    return (h - mu) * jax.lax.rsqrt(var + _LN_EPS) * gamma + beta


def _mlp_kernel(x_ref,
                w1_ref, b1_ref, g1_ref, be1_ref,
                w2_ref, b2_ref, g2_ref, be2_ref,
                w3_ref, b3_ref,
                o_ref, *, h1_true, h2_true):
    """Fused forward for one batch tile. Dot inputs bf16, accumulate/elementwise f32."""
    x = x_ref[...].astype(jnp.bfloat16)               # (TB, D) f32 -> bf16 in-kernel

    # Block 1: Linear -> LayerNorm -> SELU (Dropout == identity in eval)
    h = jnp.dot(x, w1_ref[...], preferred_element_type=jnp.float32) + b1_ref[...]
    h = _selu(_layernorm_padzero(h, g1_ref[...], be1_ref[...], h1_true))

    # Block 2: Linear -> LayerNorm -> SELU (Dropout == identity in eval)
    h = jnp.dot(h.astype(jnp.bfloat16), w2_ref[...],
                preferred_element_type=jnp.float32) + b2_ref[...]
    h = _selu(_layernorm_padzero(h, g2_ref[...], be2_ref[...], h2_true))

    # Output head (pad columns of w3/b3 are zero -> exact zero logits there)
    out = jnp.dot(h.astype(jnp.bfloat16), w3_ref[...],
                  preferred_element_type=jnp.float32) + b3_ref[...]
    o_ref[...] = out.astype(o_ref.dtype)              # bf16 writeback


def quantum_classifier_forward(x, params, *, block_b=4096):
    """x: [B, input_dim] float32. params: padded param dict from init_params().

    Returns the padded (bp, 128) bfloat16 logits block; real logits live in
    [:B, :num_classes]. Slice at the consumer (kept lazy to avoid an extra
    full re-read of the output).
    """
    B, D = x.shape
    assert D == params["input_dim"]
    h1, h2 = params["h1"], params["h2"]

    h1p = params["w1"].shape[1]
    h2p = params["w2"].shape[1]
    cp = params["w3"].shape[1]

    # Batch tile: up to `block_b` rows, always a multiple of 8 sublanes.
    tb = min(block_b, _round_up(B, 8))
    # v7x: prefer >= 2 grid steps so the "parallel" batch axis can shard across
    # both TensorCores (neutral on single-TC v5e/v6e).
    if tb > 8 and _round_up(B, tb) == tb:
        tb = max(8, _round_up(tb // 2, 8))
    bp = _round_up(B, tb)

    # Only the batch rows are padded (and only when needed); no lane pad, no cast.
    xp = x if bp == B else jnp.pad(x, ((0, bp - B), (0, 0)))

    grid = (bp // tb,)

    def full(shape):
        return pl.BlockSpec(shape, lambda i: (0, 0))   # VMEM-resident across steps

    in_specs = [
        pl.BlockSpec((tb, D), lambda i: (i, 0)),       # x tile (full-width last dim)
        full((D, h1p)), full((1, h1p)), full((1, h1p)), full((1, h1p)),
        full((h1p, h2p)), full((1, h2p)), full((1, h2p)), full((1, h2p)),
        full((h2p, cp)), full((1, cp)),
    ]
    out_specs = pl.BlockSpec((tb, cp), lambda i: (i, 0))

    param_keys = ("w1", "b1", "g1", "be1", "w2", "b2", "g2", "be2", "w3", "b3")
    w_bytes = sum(int(params[k].nbytes) for k in param_keys)
    cost = pl.CostEstimate(
        flops=2 * bp * (D * h1p + h1p * h2p + h2p * cp),
        transcendentals=bp * (h1p + h2p + 2),           # SELU exps + 2 rsqrt per row
        bytes_accessed=int(xp.nbytes) + bp * cp * 2 + w_bytes,
    )

    kernel = functools.partial(_mlp_kernel, h1_true=h1, h2_true=h2)

    out = pl.pallas_call(
        kernel,
        out_shape=jax.ShapeDtypeStruct((bp, cp), jnp.bfloat16),
        grid=grid,
        in_specs=in_specs,
        out_specs=out_specs,
        compiler_params=pltpu.CompilerParams(dimension_semantics=("parallel",)),
        cost_estimate=cost,
    )(xp, *(params[k] for k in param_keys))

    return out


def init_params(key, input_dim=100, num_classes=10, complexity_level=0.5):
    """Synthetic params matching the module's __init__ shapes.

    Returns (padded_params_for_kernel, raw_unpadded_f32_params_for_reference).
    """
    layer1 = int(128 * complexity_level)   # 64
    layer2 = int(64 * complexity_level)    # 32
    k1, k2, k3, k4, k5, k6 = jax.random.split(key, 6)

    def lin(kw, kb, fan_in, fan_out):
        bound = 1.0 / jnp.sqrt(fan_in)
        w = jax.random.uniform(kw, (fan_in, fan_out), jnp.float32, -bound, bound)
        b = jax.random.uniform(kb, (1, fan_out), jnp.float32, -bound, bound)
        return w, b

    w1, b1 = lin(k1, k2, input_dim, layer1)
    w2, b2 = lin(k3, k4, layer1, layer2)
    w3, b3 = lin(k5, k6, layer2, num_classes)
    raw = {
        "w1": w1, "b1": b1,
        "g1": jnp.ones((1, layer1), jnp.float32), "be1": jnp.zeros((1, layer1), jnp.float32),
        "w2": w2, "b2": b2,
        "g2": jnp.ones((1, layer2), jnp.float32), "be2": jnp.zeros((1, layer2), jnp.float32),
        "w3": w3, "b3": b3,
    }

    h1p = _round_up(layer1, _LANE)
    h2p = _round_up(layer2, _LANE)
    cp = _round_up(num_classes, _LANE)

    def pad2(a, rows, cols):
        return jnp.pad(a, ((0, rows - a.shape[0]), (0, cols - a.shape[1])))

    params = {
        # w1 keeps its true K rows (input_dim); only output lanes are padded.
        "w1": pad2(w1, input_dim, h1p).astype(jnp.bfloat16),
        "b1": pad2(b1, 1, h1p),
        "g1": pad2(raw["g1"], 1, h1p),
        "be1": pad2(raw["be1"], 1, h1p),
        "w2": pad2(w2, h1p, h2p).astype(jnp.bfloat16),
        "b2": pad2(b2, 1, h2p),
        "g2": pad2(raw["g2"], 1, h2p),
        "be2": pad2(raw["be2"], 1, h2p),
        "w3": pad2(w3, h2p, cp).astype(jnp.bfloat16),
        "b3": pad2(b3, 1, cp),
        "input_dim": input_dim, "h1": layer1, "h2": layer2, "num_classes": num_classes,
    }
    return params, raw


def _reference_forward(x, p, dot_dtype):
    """Pure-JAX reference. dot_dtype=bf16 mirrors the kernel's quantized matmuls."""
    def dot(a, w):
        return jnp.dot(a.astype(dot_dtype), w.astype(dot_dtype),
                       preferred_element_type=jnp.float32)

    def ln(h, g, b):
        mu = jnp.mean(h, axis=-1, keepdims=True)
        var = jnp.mean((h - mu) * (h - mu), axis=-1, keepdims=True)
        return (h - mu) * jax.lax.rsqrt(var + _LN_EPS) * g + b

    h = dot(x, p["w1"]) + p["b1"]
    h = _selu(ln(h, p["g1"], p["be1"]))
    h = dot(h, p["w2"]) + p["b2"]
    h = _selu(ln(h, p["g2"], p["be2"]))
    return dot(h, p["w3"]) + p["b3"]


if __name__ == "__main__":
    key = jax.random.PRNGKey(0)
    kx, kp = jax.random.split(key)

    B, INPUT_DIM, NUM_CLASSES, COMPLEXITY = 2, 100, 10, 0.5
    x = jax.random.normal(kx, (B, INPUT_DIM), jnp.float32)
    params, raw = init_params(kp, INPUT_DIM, NUM_CLASSES, COMPLEXITY)

    out_padded = quantum_classifier_forward(x, params)
    out_padded = jax.block_until_ready(out_padded)

    logits = out_padded[:B, :NUM_CLASSES].astype(jnp.float32)
    assert logits.shape == (B, NUM_CLASSES)

    # Precision-matched reference (bf16 dot inputs, f32 accumulate/elementwise);
    # tolerance covers the kernel's final bf16 writeback rounding.
    ref_bf16 = _reference_forward(x, raw, jnp.bfloat16)
    assert jnp.allclose(logits, ref_bf16, atol=2e-2, rtol=2e-2), "mismatch vs bf16-matched ref"

    # Loose sanity check vs full-f32 semantics of the original module.
    ref_f32 = _reference_forward(x, raw, jnp.float32)
    assert jnp.allclose(logits, ref_f32, atol=0.25, rtol=0.25), "mismatch vs f32 reference"

    print("KERNEL_OK")
</pallas_src>

<mosaic_0001>
module attributes {stable_mosaic.version = 11 : i64} {
  func.func @_mlp_kernel(%arg0: i32, %arg1: memref<8x100xf32, #tpu.memory_space<vmem>>, %arg2: memref<100x128xbf16, #tpu.memory_space<vmem>>, %arg3: memref<1x128xf32, #tpu.memory_space<vmem>>, %arg4: memref<1x128xf32, #tpu.memory_space<vmem>>, %arg5: memref<1x128xf32, #tpu.memory_space<vmem>>, %arg6: memref<128x128xbf16, #tpu.memory_space<vmem>>, %arg7: memref<1x128xf32, #tpu.memory_space<vmem>>, %arg8: memref<1x128xf32, #tpu.memory_space<vmem>>, %arg9: memref<1x128xf32, #tpu.memory_space<vmem>>, %arg10: memref<128x128xbf16, #tpu.memory_space<vmem>>, %arg11: memref<1x128xf32, #tpu.memory_space<vmem>>, %arg12: memref<8x128xbf16, #tpu.memory_space<vmem>>) attributes {dimension_semantics = [#tpu.dimension_semantics<parallel>], iteration_bounds = array<i64: 1>, scalar_prefetch = 0 : i64, scratch_operands = 0 : i64, tpu.core_type = #tpu.core_type<tc>, window_params = [{transform_indices = @transform_0, window_bounds = array<i64: 8, 100>}, {pipeline_mode = #tpu.pipeline_mode<synchronous>, transform_indices = @transform_1, window_bounds = array<i64: 100, 128>}, {pipeline_mode = #tpu.pipeline_mode<synchronous>, transform_indices = @transform_2, window_bounds = array<i64: 1, 128>}, {pipeline_mode = #tpu.pipeline_mode<synchronous>, transform_indices = @transform_3, window_bounds = array<i64: 1, 128>}, {pipeline_mode = #tpu.pipeline_mode<synchronous>, transform_indices = @transform_4, window_bounds = array<i64: 1, 128>}, {pipeline_mode = #tpu.pipeline_mode<synchronous>, transform_indices = @transform_5, window_bounds = array<i64: 128, 128>}, {pipeline_mode = #tpu.pipeline_mode<synchronous>, transform_indices = @transform_6, window_bounds = array<i64: 1, 128>}, {pipeline_mode = #tpu.pipeline_mode<synchronous>, transform_indices = @transform_7, window_bounds = array<i64: 1, 128>}, {pipeline_mode = #tpu.pipeline_mode<synchronous>, transform_indices = @transform_8, window_bounds = array<i64: 1, 128>}, {pipeline_mode = #tpu.pipeline_mode<synchronous>, transform_indices = @transform_9, window_bounds = array<i64: 128, 128>}, {pipeline_mode = #tpu.pipeline_mode<synchronous>, transform_indices = @transform_10, window_bounds = array<i64: 1, 128>}, {transform_indices = @transform_11, window_bounds = array<i64: 8, 128>}]} {
    %c0 = arith.constant 0 : index
    %c0_0 = arith.constant 0 : index
    %0 = vector.load %arg1[%c0, %c0_0] : memref<8x100xf32, #tpu.memory_space<vmem>>, vector<8x100xf32>
    %1 = arith.truncf %0 : vector<8x100xf32> to vector<8x100xbf16>
    %c0_1 = arith.constant 0 : index
    %c0_2 = arith.constant 0 : index
    %2 = vector.load %arg2[%c0_1, %c0_2] : memref<100x128xbf16, #tpu.memory_space<vmem>>, vector<100x128xbf16>
    %cst = arith.constant dense<0.000000e+00> : vector<8x128xf32>
    %3 = tpu.matmul %1, %2, %cst {dimension_numbers = #tpu.dot_dimension_numbers<[1], [0], [0], [1], [0, 0, 1, 1], [], []>} : vector<8x100xbf16>, vector<100x128xbf16>, vector<8x128xf32> -> vector<8x128xf32>
    %c0_3 = arith.constant 0 : index
    %c0_4 = arith.constant 0 : index
    %4 = vector.load %arg3[%c0_3, %c0_4] : memref<1x128xf32, #tpu.memory_space<vmem>>, vector<1x128xf32>
    %5 = vector.broadcast %4 : vector<1x128xf32> to vector<8x128xf32>
    %6 = arith.addf %3, %5 : vector<8x128xf32>
    %c0_5 = arith.constant 0 : index
    %c0_6 = arith.constant 0 : index
    %7 = vector.load %arg4[%c0_5, %c0_6] : memref<1x128xf32, #tpu.memory_space<vmem>>, vector<1x128xf32>
    %c0_7 = arith.constant 0 : index
    %c0_8 = arith.constant 0 : index
    %8 = vector.load %arg5[%c0_7, %c0_8] : memref<1x128xf32, #tpu.memory_space<vmem>>, vector<1x128xf32>
    %cst_9 = arith.constant dense<0.000000e+00> : vector<8xf32>
    %9 = vector.multi_reduction <add>, %6, %cst_9 [1] : vector<8x128xf32> to vector<8xf32>
    %10 = vector.shape_cast %9 : vector<8xf32> to vector<8x1xf32>
    %11 = arith.mulf %6, %6 : vector<8x128xf32>
    %cst_10 = arith.constant dense<0.000000e+00> : vector<8xf32>
    %12 = vector.multi_reduction <add>, %11, %cst_10 [1] : vector<8x128xf32> to vector<8xf32>
    %13 = vector.shape_cast %12 : vector<8xf32> to vector<8x1xf32>
    %cst_11 = arith.constant 1.562500e-02 : f32
    %14 = vector.broadcast %cst_11 : f32 to vector<8x1xf32>
    %15 = arith.mulf %10, %14 : vector<8x1xf32>
    %cst_12 = arith.constant 1.562500e-02 : f32
    %16 = vector.broadcast %cst_12 : f32 to vector<8x1xf32>
    %17 = arith.mulf %13, %16 : vector<8x1xf32>
    %18 = arith.mulf %15, %15 : vector<8x1xf32>
    %19 = arith.subf %17, %18 : vector<8x1xf32>
    %cst_13 = arith.constant 0.000000e+00 : f32
    %20 = vector.broadcast %cst_13 : f32 to vector<8x1xf32>
    %21 = arith.maximumf %19, %20 : vector<8x1xf32>
    %22 = vector.broadcast %15 : vector<8x1xf32> to vector<8x128xf32>
    %23 = arith.subf %6, %22 : vector<8x128xf32>
    %cst_14 = arith.constant 9.99999974E-6 : f32
    %24 = vector.broadcast %cst_14 : f32 to vector<8x1xf32>
    %25 = arith.addf %21, %24 : vector<8x1xf32>
    %26 = math.rsqrt %25 : vector<8x1xf32>
    %27 = vector.broadcast %26 : vector<8x1xf32> to vector<8x128xf32>
    %28 = arith.mulf %23, %27 : vector<8x128xf32>
    %29 = vector.broadcast %7 : vector<1x128xf32> to vector<8x128xf32>
    %30 = arith.mulf %28, %29 : vector<8x128xf32>
    %31 = vector.broadcast %8 : vector<1x128xf32> to vector<8x128xf32>
    %32 = arith.addf %30, %31 : vector<8x128xf32>
    %cst_15 = arith.constant 0.000000e+00 : f32
    %33 = vector.broadcast %cst_15 : f32 to vector<8x128xf32>
    %34 = arith.cmpf ogt, %32, %33 : vector<8x128xf32>
    %35 = math.exp %32 : vector<8x128xf32>
    %cst_16 = arith.constant 1.000000e+00 : f32
    %36 = vector.broadcast %cst_16 : f32 to vector<8x128xf32>
    %37 = arith.subf %35, %36 : vector<8x128xf32>
    %cst_17 = arith.constant 1.67326319 : f32
    %38 = vector.broadcast %cst_17 : f32 to vector<8x128xf32>
    %39 = arith.mulf %38, %37 : vector<8x128xf32>
    %40 = arith.select %34, %32, %39 : vector<8x128xi1>, vector<8x128xf32>
    %cst_18 = arith.constant 1.05070102 : f32
    %41 = vector.broadcast %cst_18 : f32 to vector<8x128xf32>
    %42 = arith.mulf %41, %40 : vector<8x128xf32>
    %43 = arith.truncf %42 : vector<8x128xf32> to vector<8x128xbf16>
    %c0_19 = arith.constant 0 : index
    %c0_20 = arith.constant 0 : index
    %44 = vector.load %arg6[%c0_19, %c0_20] : memref<128x128xbf16, #tpu.memory_space<vmem>>, vector<128x128xbf16>
    %cst_21 = arith.constant dense<0.000000e+00> : vector<8x128xf32>
    %45 = tpu.matmul %43, %44, %cst_21 {dimension_numbers = #tpu.dot_dimension_numbers<[1], [0], [0], [1], [0, 0, 1, 1], [], []>} : vector<8x128xbf16>, vector<128x128xbf16>, vector<8x128xf32> -> vector<8x128xf32>
    %c0_22 = arith.constant 0 : index
    %c0_23 = arith.constant 0 : index
    %46 = vector.load %arg7[%c0_22, %c0_23] : memref<1x128xf32, #tpu.memory_space<vmem>>, vector<1x128xf32>
    %47 = vector.broadcast %46 : vector<1x128xf32> to vector<8x128xf32>
    %48 = arith.addf %45, %47 : vector<8x128xf32>
    %c0_24 = arith.constant 0 : index
    %c0_25 = arith.constant 0 : index
    %49 = vector.load %arg8[%c0_24, %c0_25] : memref<1x128xf32, #tpu.memory_space<vmem>>, vector<1x128xf32>
    %c0_26 = arith.constant 0 : index
    %c0_27 = arith.constant 0 : index
    %50 = vector.load %arg9[%c0_26, %c0_27] : memref<1x128xf32, #tpu.memory_space<vmem>>, vector<1x128xf32>
    %cst_28 = arith.constant dense<0.000000e+00> : vector<8xf32>
    %51 = vector.multi_reduction <add>, %48, %cst_28 [1] : vector<8x128xf32> to vector<8xf32>
    %52 = vector.shape_cast %51 : vector<8xf32> to vector<8x1xf32>
    %53 = arith.mulf %48, %48 : vector<8x128xf32>
    %cst_29 = arith.constant dense<0.000000e+00> : vector<8xf32>
    %54 = vector.multi_reduction <add>, %53, %cst_29 [1] : vector<8x128xf32> to vector<8xf32>
    %55 = vector.shape_cast %54 : vector<8xf32> to vector<8x1xf32>
    %cst_30 = arith.constant 3.125000e-02 : f32
    %56 = vector.broadcast %cst_30 : f32 to vector<8x1xf32>
    %57 = arith.mulf %52, %56 : vector<8x1xf32>
    %cst_31 = arith.constant 3.125000e-02 : f32
    %58 = vector.broadcast %cst_31 : f32 to vector<8x1xf32>
    %59 = arith.mulf %55, %58 : vector<8x1xf32>
    %60 = arith.mulf %57, %57 : vector<8x1xf32>
    %61 = arith.subf %59, %60 : vector<8x1xf32>
    %cst_32 = arith.constant 0.000000e+00 : f32
    %62 = vector.broadcast %cst_32 : f32 to vector<8x1xf32>
    %63 = arith.maximumf %61, %62 : vector<8x1xf32>
    %64 = vector.broadcast %57 : vector<8x1xf32> to vector<8x128xf32>
    %65 = arith.subf %48, %64 : vector<8x128xf32>
    %cst_33 = arith.constant 9.99999974E-6 : f32
    %66 = vector.broadcast %cst_33 : f32 to vector<8x1xf32>
    %67 = arith.addf %63, %66 : vector<8x1xf32>
    %68 = math.rsqrt %67 : vector<8x1xf32>
    %69 = vector.broadcast %68 : vector<8x1xf32> to vector<8x128xf32>
    %70 = arith.mulf %65, %69 : vector<8x128xf32>
    %71 = vector.broadcast %49 : vector<1x128xf32> to vector<8x128xf32>
    %72 = arith.mulf %70, %71 : vector<8x128xf32>
    %73 = vector.broadcast %50 : vector<1x128xf32> to vector<8x128xf32>
    %74 = arith.addf %72, %73 : vector<8x128xf32>
    %cst_34 = arith.constant 0.000000e+00 : f32
    %75 = vector.broadcast %cst_34 : f32 to vector<8x128xf32>
    %76 = arith.cmpf ogt, %74, %75 : vector<8x128xf32>
    %77 = math.exp %74 : vector<8x128xf32>
    %cst_35 = arith.constant 1.000000e+00 : f32
    %78 = vector.broadcast %cst_35 : f32 to vector<8x128xf32>
    %79 = arith.subf %77, %78 : vector<8x128xf32>
    %cst_36 = arith.constant 1.67326319 : f32
    %80 = vector.broadcast %cst_36 : f32 to vector<8x128xf32>
    %81 = arith.mulf %80, %79 : vector<8x128xf32>
    %82 = arith.select %76, %74, %81 : vector<8x128xi1>, vector<8x128xf32>
    %cst_37 = arith.constant 1.05070102 : f32
    %83 = vector.broadcast %cst_37 : f32 to vector<8x128xf32>
    %84 = arith.mulf %83, %82 : vector<8x128xf32>
    %85 = arith.truncf %84 : vector<8x128xf32> to vector<8x128xbf16>
    %c0_38 = arith.constant 0 : index
    %c0_39 = arith.constant 0 : index
    %86 = vector.load %arg10[%c0_38, %c0_39] : memref<128x128xbf16, #tpu.memory_space<vmem>>, vector<128x128xbf16>
    %cst_40 = arith.constant dense<0.000000e+00> : vector<8x128xf32>
    %87 = tpu.matmul %85, %86, %cst_40 {dimension_numbers = #tpu.dot_dimension_numbers<[1], [0], [0], [1], [0, 0, 1, 1], [], []>} : vector<8x128xbf16>, vector<128x128xbf16>, vector<8x128xf32> -> vector<8x128xf32>
    %c0_41 = arith.constant 0 : index
    %c0_42 = arith.constant 0 : index
    %88 = vector.load %arg11[%c0_41, %c0_42] : memref<1x128xf32, #tpu.memory_space<vmem>>, vector<1x128xf32>
    %89 = vector.broadcast %88 : vector<1x128xf32> to vector<8x128xf32>
    %90 = arith.addf %87, %89 : vector<8x128xf32>
    %91 = arith.truncf %90 : vector<8x128xf32> to vector<8x128xbf16>
    %c0_43 = arith.constant 0 : index
    %c0_44 = arith.constant 0 : index
    %92 = vector.load %arg12[%c0_43, %c0_44] : memref<8x128xbf16, #tpu.memory_space<vmem>>, vector<8x128xbf16>
    tpu.vector_store %arg12[%c0_43, %c0_44], %91 {strides = array<i32>} : memref<8x128xbf16, #tpu.memory_space<vmem>>, vector<8x128xbf16>,
    return
  }
  func.func @transform_0(%arg0: i32) -> (i32, i32) {
    %c0_i32 = arith.constant 0 : i32
    %c0_i32_0 = arith.constant 0 : i32
    return %arg0, %c0_i32 : i32, i32
  }
  func.func @transform_1(%arg0: i32) -> (i32, i32) {
    %c0_i32 = arith.constant 0 : i32
    %c0_i32_0 = arith.constant 0 : i32
    %c0_i32_1 = arith.constant 0 : i32
    return %c0_i32, %c0_i32_0 : i32, i32
  }
  func.func @transform_2(%arg0: i32) -> (i32, i32) {
    %c0_i32 = arith.constant 0 : i32
    %c0_i32_0 = arith.constant 0 : i32
    %c0_i32_1 = arith.constant 0 : i32
    return %c0_i32, %c0_i32_0 : i32, i32
  }
  func.func @transform_3(%arg0: i32) -> (i32, i32) {
    %c0_i32 = arith.constant 0 : i32
    %c0_i32_0 = arith.constant 0 : i32
    %c0_i32_1 = arith.constant 0 : i32
    return %c0_i32, %c0_i32_0 : i32, i32
  }
  func.func @transform_4(%arg0: i32) -> (i32, i32) {
    %c0_i32 = arith.constant 0 : i32
    %c0_i32_0 = arith.constant 0 : i32
    %c0_i32_1 = arith.constant 0 : i32
    return %c0_i32, %c0_i32_0 : i32, i32
  }
  func.func @transform_5(%arg0: i32) -> (i32, i32) {
    %c0_i32 = arith.constant 0 : i32
    %c0_i32_0 = arith.constant 0 : i32
    %c0_i32_1 = arith.constant 0 : i32
    return %c0_i32, %c0_i32_0 : i32, i32
  }
  func.func @transform_6(%arg0: i32) -> (i32, i32) {
    %c0_i32 = arith.constant 0 : i32
    %c0_i32_0 = arith.constant 0 : i32
    %c0_i32_1 = arith.constant 0 : i32
    return %c0_i32, %c0_i32_0 : i32, i32
  }
  func.func @transform_7(%arg0: i32) -> (i32, i32) {
    %c0_i32 = arith.constant 0 : i32
    %c0_i32_0 = arith.constant 0 : i32
    %c0_i32_1 = arith.constant 0 : i32
    return %c0_i32, %c0_i32_0 : i32, i32
  }
  func.func @transform_8(%arg0: i32) -> (i32, i32) {
    %c0_i32 = arith.constant 0 : i32
    %c0_i32_0 = arith.constant 0 : i32
    %c0_i32_1 = arith.constant 0 : i32
    return %c0_i32, %c0_i32_0 : i32, i32
  }
  func.func @transform_9(%arg0: i32) -> (i32, i32) {
    %c0_i32 = arith.constant 0 : i32
    %c0_i32_0 = arith.constant 0 : i32
    %c0_i32_1 = arith.constant 0 : i32
    return %c0_i32, %c0_i32_0 : i32, i32
  }
  func.func @transform_10(%arg0: i32) -> (i32, i32) {
    %c0_i32 = arith.constant 0 : i32
    %c0_i32_0 = arith.constant 0 : i32
    %c0_i32_1 = arith.constant 0 : i32
    return %c0_i32, %c0_i32_0 : i32, i32
  }
  func.func @transform_11(%arg0: i32) -> (i32, i32) {
    %c0_i32 = arith.constant 0 : i32
    %c0_i32_0 = arith.constant 0 : i32
    return %arg0, %c0_i32 : i32, i32
  }
}

</mosaic_0001>

<bundles_post_ra>
// kernel: tpu_custom_call.1
= control target key start
LH: loop header
LB: loop body
LE: loop exit
PB: predicated region body
PF: predicated region fallthrough
CT: control target
= control target key end

     0   :  { %16 = vsyncpa [#allocation3], 0  ;;  %s927_s0 = inlined_call_operand.hbm [shape: f32[8,100], index: 0, kind: input, shape index: {}]   ;;  %s928_s1 = inlined_call_operand.hbm [shape: bf16[100,128], index: 1, kind: input, shape index: {}]   ;;  %s929_s2 = inlined_call_operand.vmem [shape: f32[1,128], index: 2, kind: input, shape index: {}]   ;;  %s930_s3 = inlined_call_operand.vmem [shape: f32[1,128], index: 3, kind: input, shape index: {}]   ;;  %s931_s4 = inlined_call_operand.vmem [shape: f32[1,128], index: 4, kind: input, shape index: {}]   ;;  %s932_s5 = inlined_call_operand.hbm [shape: bf16[128,128], index: 5, kind: input, shape index: {}]   ;;  %s933_s6 = inlined_call_operand.vmem [shape: f32[1,128], index: 6, kind: input, shape index: {}]   ;;  %s934_s7 = inlined_call_operand.vmem [shape: f32[1,128], index: 7, kind: input, shape index: {}]   ;;  %s935_s8 = inlined_call_operand.vmem [shape: f32[1,128], index: 8, kind: input, shape index: {}]   ;;  %s936_s9 = inlined_call_operand.hbm [shape: bf16[128,128], index: 9, kind: input, shape index: {}]   ;;  %s937_s10 = inlined_call_operand.vmem [shape: f32[1,128], index: 10, kind: input, shape index: {}]   ;;  %s938_s11 = inlined_call_operand.hbm [shape: bf16[8,128], index: 11, kind: output, shape index: {}]  }
   0x1   :  { %17 = vsyncpa [#allocation6], 0 }
   0x2   :  { %18 = vsyncpa [#allocation9], 0 }
   0x3   :  { %19 = vsyncpa [#allocation4], 0  ;;  %s784_s17 = smov [#allocation5]  }
   0x4   :  { %s35_s18 = sshll.u32 %s784_s17, 4  ;;  %s36_s18 = int_to_ptr.vmem [resolvable:$true] %s35_s18 }
   0x5   :  { %s684_s19 = scalar_lea.vmem %s36_s18, 832  ;;  %p689_p1 = scmp.lt.s32.totalorder %s36_s18, %s36_s18 }
   0x6   :  { %p685_p0 = scmp.ne.s32.totalorder %s36_s18, %s684_s19  ;;  %p690_p2 = scmp.lt.s32.totalorder %s684_s19, %s684_s19 }
   0x8   :  { %p691_p3 = por %p690_p2, %p689_p1 }
   0xa   :  { %p692_p4 = pnand %p691_p3, %p685_p0 }
   0xc   :  { %695 = shalt.err (!%p692_p4)
}
   0xd   :  { %s785_s20 = smov 64   ;;  %s786_s21 = smov 4  }
   0xe   :  { %41 = dma.hbm_to_vmem [thread:$0]  %s928_s1, 832, %s36_s18, [#allocation6], %s785_s20, %s785_s20, %s786_s21  }
   0xf   :  { %s787_s24 = smov [#allocation2]   ;;  %s788_s26 = smov [#allocation7]  }
  0x10   :  { %s26_s25 = sshll.u32 %s787_s24, 4  ;;  %s53_s27 = sshll.u32 %s788_s26, 4  ;;  %s27_s25 = int_to_ptr.vmem [resolvable:$true] %s26_s25  ;;  %s54_s27 = int_to_ptr.vmem [resolvable:$true] %s53_s27 }
  0x11   :  { %s704_s28 = scalar_lea.vmem %s27_s25, 128  ;;  %p709_p6 = scmp.lt.s32.totalorder %s27_s25, %s27_s25 }
  0x12   :  { %p705_p5 = scmp.ne.s32.totalorder %s27_s25, %s704_s28  ;;  %p710_p7 = scmp.lt.s32.totalorder %s704_s28, %s704_s28 }
  0x14   :  { %p711_p8 = por %p710_p7, %p709_p6 }
  0x16   :  { %p712_p9 = pnand %p711_p8, %p705_p5 }
  0x18   :  { %715 = shalt.err (!%p712_p9)
}
  0x19   :  { %29 = dma.hbm_to_vmem [thread:$0]  %s927_s0, 128, %s27_s25, [#allocation3]  }
  0x1a   :  { %s724_s12 = scalar_lea.vmem %s54_s27, 1024  ;;  %p729_p11 = scmp.lt.s32.totalorder %s54_s27, %s54_s27 }
  0x1b   :  { %p725_p10 = scmp.ne.s32.totalorder %s54_s27, %s724_s12  ;;  %p730_p12 = scmp.lt.s32.totalorder %s724_s12, %s724_s12 }
  0x1d   :  { %p731_p13 = por %p730_p12, %p729_p11 }
  0x1f   :  { %p732_p0 = pnand %p731_p13, %p725_p10 }
  0x21   :  { %735 = shalt.err (!%p732_p0)
}
  0x22   :  { %59 = dma.hbm_to_vmem [thread:$0]  %s932_s5, 1024, %s54_s27, [#allocation6], %s785_s20, %s785_s20, %s786_s21  }
  0x23   :  { %s789_s14 = smov [#allocation8]  }
  0x24   :  { %s71_s15 = sshll.u32 %s789_s14, 4  ;;  %s72_s15 = int_to_ptr.vmem [resolvable:$true] %s71_s15 }
  0x25   :  { %s744_s16 = scalar_lea.vmem %s72_s15, 1024  ;;  %p749_p2 = scmp.lt.s32.totalorder %s72_s15, %s72_s15 }
  0x26   :  { %p745_p1 = scmp.ne.s32.totalorder %s72_s15, %s744_s16  ;;  %p750_p3 = scmp.lt.s32.totalorder %s744_s16, %s744_s16 }
  0x28   :  { %p751_p4 = por %p750_p3, %p749_p2 }
  0x2a   :  { %p752_p5 = pnand %p751_p4, %p745_p1 }
  0x2c   :  { %755 = shalt.err (!%p752_p5)
}
  0x2d   :  { %77 = dma.hbm_to_vmem [thread:$0]  %s936_s9, 1024, %s72_s15, [#allocation9], %s785_s20, %s785_s20, %s786_s21  }
  0x2e   :  { %776 = dma.done.wait [#allocation3], 128  }
  0x2f   :  { %777 = vsyncadd [#allocation3], 4294967168 }
  0x30   :  { %778 = dma.done.wait [#allocation6], 1856  }
  0x31   :  { %779 = vsyncadd [#allocation6], 4294965440 }
  0x32   :  { %780 = dma.done.wait [#allocation9], 1024  }
  0x33   :  { %781 = vsyncadd [#allocation9], 4294966272  ;;  %v790_v0 = vmov 0.0   ;;  %vm791_vm0 = vmmov 0   ;;  %vm158_vm1 = vcmask 1041408   ;;  %v646_v3 = vld [vmem:[#allocation5 + $0x28] sm:$0xff]  }
  0x34   :  { %578 = vmatprep.subr.bf16.mxu0 %v790_v0  ;;  %592 = vmatprep.mubr.msk.bf16.mxu0 %vm791_vm0, %v790_v0  ;;  %v645_v1 = vld [vmem:[#allocation5 + $0x30] ss:$0 sps:$4 sm:$0x33]   ;;  %v647_v4 = vld [vmem:[#allocation5 + $0x20] sm:$0xff]   ;;  %v648_v5 = vld [vmem:[#allocation5 + $0x18] sm:$0xff]   ;;  %vm154_vm2 = vcmask 818176  }
  0x35   :  { %596 = vmatprep.subr.bf16.mxu1 %v790_v0  ;;  %612 = vmatprep.mubr.msk.bf16.mxu1 %vm791_vm0, %v790_v0  ;;  %v160_v2 = vsel %vm158_vm1, %v645_v1, 0  ;;  %v649_v6 = vld [vmem:[#allocation5 + $0x10] sm:$0xff]   ;;  %v650_v7 = vld [vmem:[#allocation5 + $0x8] sm:$0xff]   ;;  %v651_v8 = vld [vmem:[#allocation5] sm:$0xff]  }
  0x36   :  { %579 = vmatpush3.bf16.msra.mxu0 %v160_v2  ;;  %v93_v9 = vld [vmem:[#allocation2] sm:$0xff]  ;;  %v652_v18 = vld [vmem:[#allocation7 + $0x38] sm:$0xff]   ;;  %v653_v19 = vld [vmem:[#allocation7 + $0x30] sm:$0xff]  }
  0x37   :  { %580 = vmatprep.subr.bf16.mxu0 %v790_v0  ;;  %v94_v10 = vpack.c.bf16 %v93_v9, %v93_v9  ;;  %v519_v11 = vld [vmem:[%s929_s2] ss:$0 sm:$0xff]  ;;  %597 = vmatpush3.bf16.msra.mxu1 %v652_v18  ;;  %v654_v20 = vld [vmem:[#allocation7 + $0x28] sm:$0xff]   ;;  %v656_v22 = vld [vmem:[#allocation7 + $0x18] sm:$0xff]  }
  0x38   :  { %598 = vmatprep.subr.bf16.mxu1 %v790_v0  ;;  %v655_v21 = vld [vmem:[#allocation7 + $0x20] sm:$0xff]   ;;  %v657_v23 = vld [vmem:[#allocation7 + $0x10] sm:$0xff]   ;;  %v658_v24 = vld [vmem:[#allocation7 + $0x8] sm:$0xff]  }
  0x39   :  { %v659_v25 = vld [vmem:[#allocation7] sm:$0xff]   ;;  %v660_v55 = vld [vmem:[#allocation8 + $0x38] sm:$0xff]   ;;  %v661_v56 = vld [vmem:[#allocation8 + $0x30] sm:$0xff]  }
  0x3a   :  { %581 = vmatpush3.bf16.msra.mxu0 %v646_v3  ;;  %v528_v36 = vld [vmem:[%s930_s3] ss:$0 sm:$0xff]  ;;  %v662_v57 = vld [vmem:[#allocation8 + $0x28] sm:$0xff]   ;;  %v664_v59 = vld [vmem:[#allocation8 + $0x18] sm:$0xff]  }
  0x3b   :  { %582 = vmatprep.subr.bf16.mxu0 %v790_v0  ;;  %599 = vmatpush3.bf16.msra.mxu1 %v653_v19  ;;  %v529_v38 = vld [vmem:[%s931_s4] ss:$0 sm:$0xff]  ;;  %v665_v60 = vld [vmem:[#allocation8 + $0x10] sm:$0xff]   ;;  %v666_v61 = vld [vmem:[#allocation8 + $0x8] sm:$0xff]  }
  0x3c   :  { %600 = vmatprep.subr.bf16.mxu1 %v790_v0  ;;  %v531_v48 = vld [vmem:[%s933_s6] ss:$0 sm:$0xff] }
  0x3d   :  { %v663_v58 = vld [vmem:[#allocation8 + $0x20] sm:$0xff]  }
  0x3e   :  { %583 = vmatpush3.bf16.msra.mxu0 %v647_v4  ;;  %v667_v62 = vld [vmem:[#allocation8] sm:$0xff]  }
  0x3f   :  { %584 = vmatprep.subr.bf16.mxu0 %v790_v0  ;;  %601 = vmatpush3.bf16.msra.mxu1 %v654_v20 }
  0x40   :  { %602 = vmatprep.subr.bf16.mxu1 %v790_v0 }
  0x42   :  { %585 = vmatpush3.bf16.msra.mxu0 %v648_v5 }
  0x43   :  { %586 = vmatprep.subr.bf16.mxu0 %v790_v0  ;;  %603 = vmatpush3.bf16.msra.mxu1 %v655_v21  ;;  %v543_v21 = vld [vmem:[%s937_s10] ss:$0 sm:$0xff] }
  0x44   :  { %604 = vmatprep.subr.bf16.mxu1 %v790_v0 }
  0x46   :  { %587 = vmatpush3.bf16.msra.mxu0 %v649_v6 }
  0x47   :  { %588 = vmatprep.subr.bf16.mxu0 %v790_v0  ;;  %605 = vmatpush3.bf16.msra.mxu1 %v656_v22 }
  0x48   :  { %606 = vmatprep.subr.bf16.mxu1 %v790_v0 }
  0x4a   :  { %589 = vmatpush3.bf16.msra.mxu0 %v650_v7 }
  0x4b   :  { %590 = vmatprep.subr.bf16.mxu0 %v790_v0  ;;  %607 = vmatpush3.bf16.msra.mxu1 %v657_v23 }
  0x4c   :  { %608 = vmatprep.subr.bf16.mxu1 %v790_v0 }
  0x4e   :  { %591 = vmatpush3.bf16.msra.mxu0 %v651_v8 }
  0x4f   :  { %616 = vmatprep.subr.bf16.mxu0 %v790_v0  ;;  %609 = vmatpush3.bf16.msra.mxu1 %v658_v24 }
  0x50   :  { %610 = vmatprep.subr.bf16.mxu1 %v790_v0 }
  0x51   :  { %593 = vmatmul.mubr.msk.bf16.vlgmr.msra.gmra.mxu0 %vm154_vm2, %v94_v10  ;;  %v540_v10 = vld [vmem:[%s934_s7] ss:$0 sm:$0xff]  ;;  %s792_s7 = smov [#allocation10]  }
  0x52   :  { %632 = vmatprep.mubr.msk.bf16.mxu0 %vm791_vm0, %v790_v0  ;;  %617 = vmatpush3.bf16.msra.mxu0 %v660_v55  ;;  %s508_s26 = sshll.u32 %s792_s7, 4  ;;  %s509_s26 = int_to_ptr.vmem [resolvable:$true] %s508_s26 }
  0x53   :  { %611 = vmatpush3.bf16.msra.mxu1 %v659_v25  ;;  %618 = vmatprep.subr.bf16.mxu0 %v790_v0  ;;  %p761_p7 = scmp.lt.s32.totalorder %s509_s26, %s509_s26 }
  0x56   :  { %619 = vmatpush3.bf16.msra.mxu0 %v661_v56 }
  0x57   :  { %620 = vmatprep.subr.bf16.mxu0 %v790_v0 }
  0x5a   :  { %621 = vmatpush3.bf16.msra.mxu0 %v662_v57 }
  0x5b   :  { %622 = vmatprep.subr.bf16.mxu0 %v790_v0 }
  0x5e   :  { %623 = vmatpush3.bf16.msra.mxu0 %v663_v58 }
  0x5f   :  { %624 = vmatprep.subr.bf16.mxu0 %v790_v0 }
  0x62   :  { %625 = vmatpush3.bf16.msra.mxu0 %v664_v59 }
  0x63   :  { %626 = vmatprep.subr.bf16.mxu0 %v790_v0 }
  0x66   :  { %627 = vmatpush3.bf16.msra.mxu0 %v665_v60 }
  0x67   :  { %628 = vmatprep.subr.bf16.mxu0 %v790_v0 }
  0x6a   :  { %629 = vmatpush3.bf16.msra.mxu0 %v666_v61 }
  0x6b   :  { %630 = vmatprep.subr.bf16.mxu0 %v790_v0  ;;  %v541_v0 = vld [vmem:[%s935_s8] ss:$0 sm:$0xff]  ;;  %s756_s8 = scalar_lea.vmem %s509_s26, 64 }
  0x6c   :  { %p757_p6 = scmp.ne.s32.totalorder %s509_s26, %s756_s8  ;;  %p762_p8 = scmp.lt.s32.totalorder %s756_s8, %s756_s8 }
  0x6e   :  { %631 = vmatpush3.bf16.msra.mxu0 %v667_v62  ;;  %p763_p9 = por %p762_p8, %p761_p7 }
  0x70   :  { %p764_p10 = pnand %p763_p9, %p757_p6 }
 0x111   :  { %v196_v12 = vpop.f32.mrf.mxu0 }
 0x112   :  { %v197_v13 = vadd.f32 %v519_v11, %v196_v12 }
 0x113   :  { %v594_v14 = vpop.f32.mrf.mxu0 }
 0x114   :  { %204 = vadd.xlane.f32.xlu0 %v197_v13  ;;  %v206_v16 = vmul.f32 %v197_v13, %v197_v13 }
 0x115   :  { %v199_v15 = vpop.f32.mrf.mxu0 }
 0x117   :  { %v595_v17 = vpop.f32.mrf.mxu0 }
 0x118   :  { %207 = vadd.xlane.f32.xlu0 %v206_v16 }
 0x19d   :  { %v205_v26 = vpop.xlane.xlu0 %204 }
 0x19e   :  { %v209_v27 = vmul.f32 0.015625, %v205_v26 }
 0x1a0   :  { %v211_v29 = vmul.f32 %v209_v27, %v209_v27  ;;  %v214_v34 = vsub.f32 %v197_v13, %v209_v27 }
 0x1a1   :  { %v208_v28 = vpop.xlane.xlu0 %207 }
 0x1a2   :  { %v210_v30 = vmul.f32 0.015625, %v208_v28 }
 0x1a4   :  { %v212_v31 = vsub.f32 %v210_v30, %v211_v29 }
 0x1a6   :  { %v213_v32 = vmax.f32 %v212_v31, 0.0 }
 0x1a8   :  { %v215_v33 = vadd.f32 1e-05, %v213_v32 }
 0x1aa   :  { %668 = vrsqrt.f32 %v215_v33 }
 0x1b7   :  { %v669_v35 = vpop.eup %668 }
 0x1b8   :  { %v217_v37 = vmul.f32 %v669_v35, %v214_v34 }
 0x1ba   :  { %v224_v39 = vmul.f32 %v528_v36, %v217_v37 }
 0x1bc   :  { %v231_v40 = vadd.f32 %v529_v38, %v224_v39 }
 0x1be   :  { %v233_v41 = vmul.f32 1.442695, %v231_v40  ;;  %vm232_vm3 = vcmp.gt.f32.partialorder %v231_v40, 0.0 }
 0x1c0   :  { %670 = vpow2.f32 %v233_v41 }
 0x1cd   :  { %v671_v42 = vpop.eup %670 }
 0x1ce   :  { %v530_v43 = vadd.f32 -1.0, %v671_v42 }
 0x1d0   :  { %v236_v44 = vmul.f32 1.6732632, %v530_v43 }
 0x1d2   :  { %v237_v45 = vsel %vm232_vm3, %v231_v40, %v236_v44 }
 0x1d3   :  { %v238_v46 = vmul.f32 1.050701, %v237_v45 }
 0x1d5   :  { %v239_v47 = vpack.c.bf16 %v238_v46, %v238_v46 }
 0x1d7   :  { %613 = vmatmul.mubr.bf16.vlgmr.msra.gmra.mxu1 %v239_v47 }
 0x297   :  { %v345_v49 = vpop.f32.mrf.mxu1 }
 0x298   :  { %v346_v50 = vadd.f32 %v531_v48, %v345_v49 }
 0x299   :  { %v614_v51 = vpop.f32.mrf.mxu1 }
 0x29a   :  { %353 = vadd.xlane.f32.xlu1 %v346_v50  ;;  %v355_v53 = vmul.f32 %v346_v50, %v346_v50 }
 0x29b   :  { %v348_v52 = vpop.f32.mrf.mxu1 }
 0x29d   :  { %v615_v54 = vpop.f32.mrf.mxu1 }
 0x29e   :  { %356 = vadd.xlane.f32.xlu1 %v355_v53 }
 0x323   :  { %v354_v63 = vpop.xlane.xlu1 %353 }
 0x324   :  { %v358_v1 = vmul.f32 0.03125, %v354_v63 }
 0x326   :  { %v360_v3 = vmul.f32 %v358_v1, %v358_v1  ;;  %v363_v8 = vsub.f32 %v346_v50, %v358_v1 }
 0x327   :  { %v357_v2 = vpop.xlane.xlu1 %356 }
 0x328   :  { %v359_v4 = vmul.f32 0.03125, %v357_v2 }
 0x32a   :  { %v361_v5 = vsub.f32 %v359_v4, %v360_v3 }
 0x32c   :  { %v362_v6 = vmax.f32 %v361_v5, 0.0 }
 0x32e   :  { %v364_v7 = vadd.f32 1e-05, %v362_v6 }
 0x330   :  { %672 = vrsqrt.f32 %v364_v7 }
 0x33d   :  { %v673_v9 = vpop.eup %672 }
 0x33e   :  { %v366_v11 = vmul.f32 %v673_v9, %v363_v8 }
 0x340   :  { %v373_v12 = vmul.f32 %v540_v10, %v366_v11 }
 0x342   :  { %v380_v13 = vadd.f32 %v541_v0, %v373_v12 }
 0x344   :  { %v382_v14 = vmul.f32 1.442695, %v380_v13  ;;  %vm381_vm4 = vcmp.gt.f32.partialorder %v380_v13, 0.0 }
 0x346   :  { %674 = vpow2.f32 %v382_v14 }
 0x353   :  { %v675_v15 = vpop.eup %674 }
 0x354   :  { %v542_v16 = vadd.f32 -1.0, %v675_v15 }
 0x356   :  { %v385_v17 = vmul.f32 1.6732632, %v542_v16 }
 0x358   :  { %v386_v18 = vsel %vm381_vm4, %v380_v13, %v385_v17 }
 0x359   :  { %v387_v19 = vmul.f32 1.050701, %v386_v18 }
 0x35b   :  { %v388_v20 = vpack.c.bf16 %v387_v19, %v387_v19 }
 0x35d   :  { %633 = vmatmul.mubr.bf16.vlgmr.msra.gmra.mxu0 %v388_v20 }
 0x41d   :  { %v494_v22 = vpop.f32.mrf.mxu0 }
 0x41e   :  { %v495_v23 = vadd.f32 %v543_v21, %v494_v22 }
 0x41f   :  { %v634_v24 = vpop.f32.mrf.mxu0 }
 0x420   :  { %v500_v25 = vpack.c.bf16 %v495_v23, %v495_v23 }
 0x421   :  { %v497_v26 = vpop.f32.mrf.mxu0 }
 0x422   :  { %501 = vst [vmem:[#allocation10] sm:$0xf] %v500_v25 }
 0x423   :  { %v635_v27 = vpop.f32.mrf.mxu0 }
 0x424   :  { %767 = shalt.err (!%p764_p10)
}
 0x425   :  { %511 = dma.vmem_to_hbm [thread:$0]  %s509_s26, 64, %s938_s11, [#allocation4]  }
 0x426   :  { %782 = dma.done.wait [#allocation4], 64  }
 0x427   :  { %783 = vsyncadd [#allocation4], 4294967232 }
 0x428   :  { %515 = vsyncpa [#allocation3], 1 }
 0x429   :  { %516 = vsyncpa [#allocation6], 1 }
 0x42a   :  { %517 = vsyncpa [#allocation9], 1 }
 0x42b   :  { %518 = vsyncpa [#allocation4], 1 }

</bundles_post_ra>
